<compile_context>
chip_gen: v6e
topology: v6e:2x2x1
jax: 0.10.0
libtpu: 0.0.40
codegen_flags: <defaults>
</compile_context>

<pallas_src>
import math

import jax
import jax.numpy as jnp
from jax.experimental import pallas as pl
from jax.experimental.pallas import tpu as pltpu

# ---------------- config (small synthetic sizes consistent with the module) --
VOCAB = 50        # config.n_vocab
D = 32            # config.d_model
MAX_LEN = 16      # config.max_len
DROPOUT_P = 0.1   # config.dropout  (identity in eval mode)
S = 8             # example sequence length (<= MAX_LEN)
B = 2             # example batch


# ---------------- PE buffer (identical to the PyTorch __init__ code) ---------
def build_pe(max_len, d_model):
    position = jnp.arange(max_len, dtype=jnp.float32)[:, None]          # (L,1)
    div_term = jnp.exp(jnp.arange(0, d_model, 2, dtype=jnp.float32)
                       * (-math.log(10000.0) / d_model))                # (D/2,)
    ang = position * div_term                                           # (L,D/2)
    pe = jnp.zeros((max_len, d_model), jnp.float32)
    pe = pe.at[:, 0::2].set(jnp.sin(ang))
    pe = pe.at[:, 1::2].set(jnp.cos(ang))
    return pe                                                           # (L,D)


# ---------------- fused Pallas kernel -----------------------------------------
def embedding_kernel(tok_ref, emb_ref, pe_ref, o_ref):
    # tok_ref : (S*B, 1) int32   token ids (seq-major flatten of (S, B))
    # emb_ref : (VOCAB, D) f32   embedding table, fully VMEM resident
    # pe_ref  : (S*B, D) f32     PE rows already repeated over batch
    # o_ref   : (S*B, D) f32
    tok = tok_ref[...]                                                # (SB, 1)
    sb = tok.shape[0]
    vocab = emb_ref.shape[0]

    # Embedding lookup as one-hot @ table: a single MXU matmul, no gather.
    vocab_iota = jax.lax.broadcasted_iota(jnp.int32, (sb, vocab), 1)  # (SB, V)
    onehot = (vocab_iota == tok).astype(jnp.float32)
    x = jnp.dot(onehot, emb_ref[...],
                preferred_element_type=jnp.float32)                   # (SB, D)

    # positional encoding; dropout is identity in eval mode.
    # TODO(synk): training-mode dropout (Bernoulli mask via pltpu.prng_*)
    #             is not implemented; eval semantics only.
    o_ref[...] = (x + pe_ref[...]).astype(o_ref.dtype)


# ---------------- wrapper ------------------------------------------------------
@jax.jit
def transformer_embedding_forward(tokens, emb_table, pe_buffer):
    """tokens: (S, B) int32  ->  (S, B, D) float32 (PyTorch eval semantics)."""
    s, b = tokens.shape
    d = emb_table.shape[1]
    sb = s * b

    tok_flat = tokens.reshape(sb, 1)                    # seq-major rows
    pe_slab = jnp.repeat(pe_buffer[:s], b, axis=0)      # (S*B, D): pe[row // B]

    out = pl.pallas_call(
        embedding_kernel,
        out_shape=jax.ShapeDtypeStruct((sb, d), jnp.float32),
        grid=(1,),
        in_specs=[
            pl.BlockSpec((sb, 1), lambda i: (0, 0)),
            pl.BlockSpec(emb_table.shape, lambda i: (0, 0)),
            pl.BlockSpec((sb, d), lambda i: (0, 0)),
        ],
        out_specs=pl.BlockSpec((sb, d), lambda i: (0, 0)),
        compiler_params=pltpu.CompilerParams(
            dimension_semantics=("arbitrary",)),
    )(tok_flat, emb_table, pe_slab)

    return out.reshape(s, b, d)      # matches the PyTorch output layout (S, B, D)


# ---------------- demo / self-check -------------------------------------------
if __name__ == "__main__":
    key = jax.random.PRNGKey(0)
    k_emb, k_tok = jax.random.split(key)

    # nn.Embedding weight (deterministic) and the registered PE buffer.
    emb_table = jax.random.normal(k_emb, (VOCAB, D), dtype=jnp.float32) * 0.1
    pe_buffer = build_pe(MAX_LEN, D)

    tokens = jax.random.randint(k_tok, (S, B), 0, VOCAB, dtype=jnp.int32)

    out = transformer_embedding_forward(tokens, emb_table, pe_buffer)
    out = jax.block_until_ready(out)

    # pure-JAX reference of the PyTorch forward (eval mode: dropout == identity)
    ref = jnp.take(emb_table, tokens, axis=0) + pe_buffer[:S][:, None, :]

    assert out.shape == (S, B, D), out.shape
    assert bool(jnp.all(jnp.isfinite(out)))
    # tolerance covers a possible bf16 MXU pass for the one-hot matmul
    # (|emb| <= ~0.5 -> abs err <= ~1e-3); full-f32 paths land around 1e-7.
    assert bool(jnp.allclose(out, ref, atol=2e-3, rtol=0.0)), \
        float(jnp.max(jnp.abs(out - ref)))
    print("KERNEL_OK")
</pallas_src>

<mosaic_0001>
module attributes {stable_mosaic.version = 11 : i64} {
  func.func @embedding_kernel(%arg0: i32, %arg1: memref<16x1xi32, #tpu.memory_space<vmem>>, %arg2: memref<50x32xf32, #tpu.memory_space<vmem>>, %arg3: memref<16x32xf32, #tpu.memory_space<vmem>>, %arg4: memref<16x32xf32, #tpu.memory_space<vmem>>) attributes {dimension_semantics = [#tpu.dimension_semantics<arbitrary>], iteration_bounds = array<i64: 1>, scalar_prefetch = 0 : i64, scratch_operands = 0 : i64, tpu.core_type = #tpu.core_type<tc>, window_params = [{pipeline_mode = #tpu.pipeline_mode<synchronous>, transform_indices = @transform_0, window_bounds = array<i64: 16, 1>}, {pipeline_mode = #tpu.pipeline_mode<synchronous>, transform_indices = @transform_1, window_bounds = array<i64: 50, 32>}, {pipeline_mode = #tpu.pipeline_mode<synchronous>, transform_indices = @transform_2, window_bounds = array<i64: 16, 32>}, {pipeline_mode = #tpu.pipeline_mode<synchronous>, transform_indices = @transform_3, window_bounds = array<i64: 16, 32>}]} {
    %c0 = arith.constant 0 : index
    %c0_0 = arith.constant 0 : index
    %0 = vector.load %arg1[%c0, %c0_0] : memref<16x1xi32, #tpu.memory_space<vmem>>, vector<16x1xi32>
    %1 = tpu.iota {dimensions = array<i32: 1>} : vector<16x50xi32>
    %2 = vector.broadcast %0 : vector<16x1xi32> to vector<16x50xi32>
    %3 = arith.cmpi eq, %1, %2 : vector<16x50xi32>
    %4 = arith.extui %3 : vector<16x50xi1> to vector<16x50xi32>
    %5 = arith.sitofp %4 : vector<16x50xi32> to vector<16x50xf32>
    %c0_1 = arith.constant 0 : index
    %c0_2 = arith.constant 0 : index
    %6 = vector.load %arg2[%c0_1, %c0_2] : memref<50x32xf32, #tpu.memory_space<vmem>>, vector<50x32xf32>
    %cst = arith.constant dense<0.000000e+00> : vector<16x32xf32>
    %7 = tpu.matmul %5, %6, %cst {dimension_numbers = #tpu.dot_dimension_numbers<[1], [0], [0], [1], [0, 0, 1, 1], [], []>} : vector<16x50xf32>, vector<50x32xf32>, vector<16x32xf32> -> vector<16x32xf32>
    %c0_3 = arith.constant 0 : index
    %c0_4 = arith.constant 0 : index
    %8 = vector.load %arg3[%c0_3, %c0_4] : memref<16x32xf32, #tpu.memory_space<vmem>>, vector<16x32xf32>
    %9 = arith.addf %7, %8 : vector<16x32xf32>
    %c0_5 = arith.constant 0 : index
    %c0_6 = arith.constant 0 : index
    %10 = vector.load %arg4[%c0_5, %c0_6] : memref<16x32xf32, #tpu.memory_space<vmem>>, vector<16x32xf32>
    tpu.vector_store %arg4[%c0_5, %c0_6], %9 {strides = array<i32>} : memref<16x32xf32, #tpu.memory_space<vmem>>, vector<16x32xf32>,
    return
  }
  func.func @transform_0(%arg0: i32) -> (i32, i32) {
    %c0_i32 = arith.constant 0 : i32
    %c0_i32_0 = arith.constant 0 : i32
    %c0_i32_1 = arith.constant 0 : i32
    return %c0_i32, %c0_i32_0 : i32, i32
  }
  func.func @transform_1(%arg0: i32) -> (i32, i32) {
    %c0_i32 = arith.constant 0 : i32
    %c0_i32_0 = arith.constant 0 : i32
    %c0_i32_1 = arith.constant 0 : i32
    return %c0_i32, %c0_i32_0 : i32, i32
  }
  func.func @transform_2(%arg0: i32) -> (i32, i32) {
    %c0_i32 = arith.constant 0 : i32
    %c0_i32_0 = arith.constant 0 : i32
    %c0_i32_1 = arith.constant 0 : i32
    return %c0_i32, %c0_i32_0 : i32, i32
  }
  func.func @transform_3(%arg0: i32) -> (i32, i32) {
    %c0_i32 = arith.constant 0 : i32
    %c0_i32_0 = arith.constant 0 : i32
    %c0_i32_1 = arith.constant 0 : i32
    return %c0_i32, %c0_i32_0 : i32, i32
  }
}

</mosaic_0001>

<bundles_post_ra>
// kernel: transformer_embedding_forward.1
= control target key start
LH: loop header
LB: loop body
LE: loop exit
PB: predicated region body
PF: predicated region fallthrough
CT: control target
= control target key end

     0   :  { %vm47_vm0 = vcmask 1041408   ;;  %v204_v2 = vmov 0   ;;  %s265_s0 = inlined_call_operand.vmem [shape: s32[16,1], index: 0, kind: input, shape index: {}]   ;;  %s266_s1 = inlined_call_operand.vmem [shape: f32[50,32], index: 1, kind: input, shape index: {}]   ;;  %s267_s2 = inlined_call_operand.vmem [shape: f32[16,32], index: 2, kind: input, shape index: {}]   ;;  %s268_s3 = inlined_call_operand.hbm [shape: f32[16,32], index: 3, kind: output, shape index: {}]  }
   0x1   :  { %v15_v0 = vld [vmem:[%s265_s0] sm:$0xff]  ;;  %v37_v1 = vld [vmem:[%s266_s1 + $0x30] sm:$0x3]  ;;  %181 = vset.pattern.permute.xlu0 %v204_v2  ;;  %v36_v3 = vld [vmem:[%s266_s1 + $0x28] sm:$0xff] }
   0x2   :  { %159 = vmatprep.subr.msk.mxu0 %vm47_vm0, %v37_v1  ;;  %20 = vperm.xlu0 %181, %v15_v0   ;;  %v35_v4 = vld [vmem:[%s266_s1 + $0x20] sm:$0xff]  ;;  %v16_v5 = vld [vmem:[%s265_s0 + $0x8] sm:$0xff] }
   0x3   :  { %160 = vmatpush3.msk.msra.mxu0 %vm47_vm0, %v37_v1 }
   0x4   :  { %161 = vmatprep.subr.mxu0 %v36_v3 }
   0x5   :  { %8 = vsyncpa [#allocation3], 0  ;;  %162 = vmatpush3.msra.mxu0 %v36_v3  ;;  %v34_v6 = vld [vmem:[%s266_s1 + $0x18] sm:$0xff]  ;;  %v33_v7 = vld [vmem:[%s266_s1 + $0x10] sm:$0xff]  ;;  %v17_v10 = vlaneseq  ;;  %vm40_vm1 = vcmask 408576   ;;  %v205_v13 = vmov 0.0  }
   0x6   :  { %163 = vmatprep.subr.mxu0 %v35_v4  ;;  %23 = vperm.xlu0 %181, %v16_v5   ;;  %v32_v8 = vld [vmem:[%s266_s1 + $0x8] sm:$0xff]  ;;  %v31_v9 = vld [vmem:[%s266_s1] sm:$0xff]  ;;  %s206_s1 = smov [#allocation2]   ;;  %vm126_vm4 = vcmask 261120  }
   0x7   :  { %164 = vmatpush3.msra.mxu0 %v35_v4  ;;  %v18_v11 = vand.u32 127, %v17_v10  ;;  %v39_v17 = vld [vmem:[%s267_s2 + $0x8] sm:$0xff]  ;;  %s134_s4 = sshll.u32 %s206_s1, 4  ;;  %v38_v19 = vld [vmem:[%s267_s2] sm:$0xff]  ;;  %s135_s4 = int_to_ptr.vmem [resolvable:$true] %s134_s4 }
   0x8   :  { %165 = vmatprep.subr.mxu0 %v34_v6  ;;  %s182_s7 = scalar_lea.vmem %s135_s4, 256  ;;  %p187_p1 = scmp.lt.s32.totalorder %s135_s4, %s135_s4 }
   0x9   :  { %166 = vmatpush3.msra.mxu0 %v34_v6  ;;  %p183_p0 = scmp.ne.s32.totalorder %s135_s4, %s182_s7  ;;  %p188_p2 = scmp.lt.s32.totalorder %s182_s7, %s182_s7 }
   0xa   :  { %167 = vmatprep.subr.mxu0 %v33_v7 }
   0xb   :  { %168 = vmatpush3.msra.mxu0 %v33_v7  ;;  %p189_p3 = por %p188_p2, %p187_p1 }
   0xc   :  { %169 = vmatprep.subr.mxu0 %v32_v8 }
   0xd   :  { %170 = vmatpush3.msra.mxu0 %v32_v8  ;;  %p190_p4 = pnand %p189_p3, %p183_p0 }
   0xe   :  { %171 = vmatprep.subr.mxu0 %v31_v9 }
   0xf   :  { %172 = vmatpush3.msra.mxu0 %v31_v9 }
  0x7d   :  { %v21_v12 = vpop.permute.xlu0 %20 }
  0x7e   :  { %vm25_vm2 = vcmp.eq.s32.totalorder %v18_v11, %v21_v12 }
  0x7f   :  { %v145_v14 = vsel %vm25_vm2, 1.0, %v205_v13 }
  0x80   :  { %173 = vmatprep.mubr.msk.f32.mxu0 %vm40_vm1, %v145_v14 }
  0x81   :  { %v24_v15 = vpop.permute.xlu0 %23 }
  0x82   :  { %vm26_vm3 = vcmp.eq.s32.totalorder %v18_v11, %v24_v15 }
  0x83   :  { %v146_v16 = vsel %vm26_vm3, 1.0, %v205_v13 }
  0x84   :  { %174 = vmatmul.mubr.msk.f32.vlgmr.msra.gmra.mxu0 %vm40_vm1, %v146_v16 }
 0x144   :  { %v175_v18 = vpop.f32.mrf.mxu0 }
 0x145   :  { %v123_v20 = vadd.f32 %v175_v18, %v39_v17 }
 0x146   :  { %v117_v21 = vpop.f32.mrf.mxu0 }
 0x147   :  { %128 = vst.msk [vmem:[#allocation2 + $0x8] sm:$0xff] %vm126_vm4, %v123_v20  ;;  %v118_v22 = vadd.f32 %v117_v21, %v38_v19 }
 0x149   :  { %127 = vst.msk [vmem:[#allocation2] sm:$0xff] %vm126_vm4, %v118_v22 }
 0x14a   :  { %193 = shalt.err (!%p190_p4)
}
 0x14b   :  { %s207_s8 = smov 128   ;;  %s208_s9 = smov 8  }
 0x14c   :  { %140 = dma.vmem_to_hbm [thread:$0]  %s135_s4, 256, %s268_s3, [#allocation3], %s207_s8, %s207_s8, %s208_s9  }
 0x14d   :  { %202 = dma.done.wait [#allocation3], 256  }
 0x14e   :  { %203 = vsyncadd [#allocation3], 4294967040 }
 0x14f   :  { %144 = vsyncpa [#allocation3], 1 }

</bundles_post_ra>
